<compile_context>
chip_gen: v5e
topology: v5e:2x2
jax: 0.10.0
libtpu: 0.0.40
codegen_flags: <defaults>
</compile_context>

<pallas_src>
import math
from functools import partial

import jax
import jax.numpy as jnp
from jax.experimental import pallas as pl
from jax.experimental.pallas import tpu as pltpu

VTH = 0.5
TAU = 0.25
BN_EPS = 1e-5

_VMEM_BUDGET = 12 * 1024 * 1024      # conservative: fits v5e/v6e/v7x scoped defaults
_MM_VMEM_LIMIT = 32 * 1024 * 1024    # == v7x scoped default; raises v5e's 16 MiB default
_TILE_CANDS = (2048, 1536, 1024, 768, 512, 384, 256, 128, 64, 32, 16, 8)


# --------------------------------------------------------------------------- helpers
def _pad_to(n, m):
    return ((n + m - 1) // m) * m


def _pick_row_tile(nrows, bytes_per_row, budget=_VMEM_BUDGET, max_tile=2048):
    """Largest row tile (multiple of 8, dividing nrows) that fits the VMEM budget."""
    cap = max(8, min(max_tile, budget // max(bytes_per_row, 1)))
    if nrows <= cap:
        return nrows                       # nrows is always a multiple of 8 here
    for c in _TILE_CANDS:
        if c <= cap and nrows % c == 0:
            return c
    return 8


def _pick_col_tile(cp, max_tile=512):
    if cp <= max_tile:
        return cp
    for c in (512, 384, 256, 128):
        if cp % c == 0:
            return c
    return 128


def _pick_mm_tiles(m, kp, np_):
    tn = 256 if np_ % 256 == 0 else 128
    fixed = 2 * kp * tn * 2 + 6 * tn * 4           # B double-buffered (bf16) + stats
    per_row = 2 * kp * 2 + 2 * tn * 4              # A double-buffered bf16 + out f32
    budget = max(_VMEM_BUDGET - fixed, 16 * per_row)
    tm = _pick_row_tile(m, per_row, budget=budget, max_tile=512)
    return tm, tn


def _pad_rows(x, pp):
    t, p, c = x.shape
    if pp == p:
        return x
    return jnp.zeros((t, pp, c), x.dtype).at[:, :p].set(x)


# --------------------------------------------------------------------------- conv matmul (+ fused tdBN stats)
def _mm_stats_kernel(a_ref, b_ref, o_ref, s_ref, sq_ref):
    """(tm, Kp) x (Kp, tn) MXU matmul with tdBN sum / sum-of-squares fused as epilogue.

    grid = (N-tiles, M-tiles); the stats blocks stay resident across the inner M axis.
    """
    y = jnp.dot(a_ref[...], b_ref[...], preferred_element_type=jnp.float32)
    o_ref[...] = y

    @pl.when(pl.program_id(1) == 0)
    def _():
        s_ref[...] = jnp.zeros_like(s_ref)
        sq_ref[...] = jnp.zeros_like(sq_ref)

    s_ref[...] += jnp.sum(y, axis=0, keepdims=True)
    sq_ref[...] += jnp.sum(y * y, axis=0, keepdims=True)


def matmul_bn_stats(a, b):
    """a: [M, Kp] bf16 (spikes / activations), b: [Kp, Np] bf16 pre-padded weights.

    Returns (y [M, Np] f32, col_sum [Np] f32, col_sumsq [Np] f32).
    Padded rows of `a` are all-zero, so they do not perturb the statistics.
    """
    m, kp = a.shape
    kb, np_ = b.shape
    assert kp == kb and m % 8 == 0 and kp % 128 == 0 and np_ % 128 == 0
    tm, tn = _pick_mm_tiles(m, kp, np_)
    y, s, sq = pl.pallas_call(
        _mm_stats_kernel,
        out_shape=(jax.ShapeDtypeStruct((m, np_), jnp.float32),
                   jax.ShapeDtypeStruct((1, np_), jnp.float32),
                   jax.ShapeDtypeStruct((1, np_), jnp.float32)),
        grid_spec=pltpu.PrefetchScalarGridSpec(
            num_scalar_prefetch=0,
            grid=(np_ // tn, m // tm),
            in_specs=[pl.BlockSpec((tm, kp), lambda j, i: (i, 0)),
                      pl.BlockSpec((kp, tn), lambda j, i: (0, j))],
            out_specs=(pl.BlockSpec((tm, tn), lambda j, i: (i, j)),
                       pl.BlockSpec((1, tn), lambda j, i: (0, j)),
                       pl.BlockSpec((1, tn), lambda j, i: (0, j)))),
        compiler_params=pltpu.CompilerParams(
            dimension_semantics=("parallel", "arbitrary"),
            vmem_limit_bytes=_MM_VMEM_LIMIT),
    )(a, b)
    return y, s[0], sq[0]


# --------------------------------------------------------------------------- fused tdBN affine + LIFSpike
def bn_scale_shift(col_sum, col_sumsq, count, gamma_p, beta_p, alpha):
    """tdBN -> per-channel (scale, shift).  Padded channels (gamma=0) give scale=shift=0."""
    mean = col_sum / count
    # NOTE: E[x^2]-E[x]^2 in f32; clamped >= 0 (a two-pass reduction would be exact).
    var = jnp.maximum(col_sumsq / count - mean * mean, 0.0)
    scale = alpha * VTH * gamma_p / jnp.sqrt(var + BN_EPS)
    shift = beta_p - mean * scale
    return scale.reshape(1, -1), shift.reshape(1, -1)


def _make_bn_lif_kernel(tp, p_valid, need_mask):
    def kernel(y_ref, sc_ref, sh_ref, o_ref, u_ref):
        @pl.when(pl.program_id(2) == 0)
        def _():
            u_ref[...] = jnp.zeros_like(u_ref)

        x = y_ref[0] * sc_ref[...] + sh_ref[...]
        u = TAU * u_ref[...] + x                  # u_ref holds u_{t-1} * (1 - o_{t-1})
        spk = u > VTH
        u_ref[...] = jnp.where(spk, 0.0, u)
        if need_mask:                             # zero spikes on padded (invalid) rows
            rows = (jax.lax.broadcasted_iota(jnp.int32, u.shape, 0)
                    + pl.program_id(0) * tp)
            spk = jnp.logical_and(spk, rows < p_valid)
        o_ref[0] = spk.astype(o_ref.dtype)
    return kernel


def bn_lif(y, scale, shift, p_valid):
    """Fused tdBN affine + LIFSpike.

    y: [T, Pp, Cp] f32 (conv output); scale/shift: [1, Cp].
    Returns bf16 spikes [T, Pp, Cp]; spikes on padded rows/channels are zero, so they
    contribute nothing to the next conv's fused BN statistics.
    """
    t, pp, cp = y.shape
    tc = _pick_col_tile(cp)
    tp = _pick_row_tile(pp, 16 * tc)
    kernel = _make_bn_lif_kernel(tp, p_valid, pp != p_valid)
    return pl.pallas_call(
        kernel,
        out_shape=jax.ShapeDtypeStruct((t, pp, cp), jnp.bfloat16),
        grid_spec=pltpu.PrefetchScalarGridSpec(
            num_scalar_prefetch=0,
            grid=(pp // tp, cp // tc, t),
            in_specs=[pl.BlockSpec((1, tp, tc), lambda i, c, tt: (tt, i, c)),
                      pl.BlockSpec((1, tc), lambda i, c, tt: (0, c)),
                      pl.BlockSpec((1, tc), lambda i, c, tt: (0, c))],
            out_specs=pl.BlockSpec((1, tp, tc), lambda i, c, tt: (tt, i, c)),
            scratch_shapes=[pltpu.VMEM((tp, tc), jnp.float32)]),
        compiler_params=pltpu.CompilerParams(
            dimension_semantics=("parallel", "parallel", "arbitrary")),
    )(y, scale, shift)


# --------------------------------------------------------------------------- fused tdBN affine + residual add
def _bn_add_kernel(y_ref, sc_ref, sh_ref, r_ref, o_ref):
    o_ref[...] = y_ref[...] * sc_ref[...] + sh_ref[...] + r_ref[...]


def _bn_bn_add_kernel(y_ref, sc_ref, sh_ref, yd_ref, scd_ref, shd_ref, o_ref):
    o_ref[...] = (y_ref[...] * sc_ref[...] + sh_ref[...]
                  + yd_ref[...] * scd_ref[...] + shd_ref[...])


def bn_add_residual(y, scale, shift, res):
    """out = tdBN_affine(y) + res      (conv3_s BN + identity, fused)."""
    m, cp = y.shape
    tc = _pick_col_tile(cp)
    tm = _pick_row_tile(m, 3 * 2 * 4 * tc)
    return pl.pallas_call(
        _bn_add_kernel,
        out_shape=jax.ShapeDtypeStruct((m, cp), jnp.float32),
        grid_spec=pltpu.PrefetchScalarGridSpec(
            num_scalar_prefetch=0,
            grid=(m // tm, cp // tc),
            in_specs=[pl.BlockSpec((tm, tc), lambda i, c: (i, c)),
                      pl.BlockSpec((1, tc), lambda i, c: (0, c)),
                      pl.BlockSpec((1, tc), lambda i, c: (0, c)),
                      pl.BlockSpec((tm, tc), lambda i, c: (i, c))],
            out_specs=pl.BlockSpec((tm, tc), lambda i, c: (i, c))),
        compiler_params=pltpu.CompilerParams(
            dimension_semantics=("parallel", "parallel")),
    )(y, scale, shift, res)


def bn_add_bn(y, scale, shift, yd, scale_d, shift_d):
    """out = tdBN_affine(y) + tdBN_affine(yd)   (conv3_s BN + downsample BN, fused)."""
    m, cp = y.shape
    tc = _pick_col_tile(cp)
    tm = _pick_row_tile(m, 3 * 2 * 4 * tc)
    return pl.pallas_call(
        _bn_bn_add_kernel,
        out_shape=jax.ShapeDtypeStruct((m, cp), jnp.float32),
        grid_spec=pltpu.PrefetchScalarGridSpec(
            num_scalar_prefetch=0,
            grid=(m // tm, cp // tc),
            in_specs=[pl.BlockSpec((tm, tc), lambda i, c: (i, c)),
                      pl.BlockSpec((1, tc), lambda i, c: (0, c)),
                      pl.BlockSpec((1, tc), lambda i, c: (0, c)),
                      pl.BlockSpec((tm, tc), lambda i, c: (i, c)),
                      pl.BlockSpec((1, tc), lambda i, c: (0, c)),
                      pl.BlockSpec((1, tc), lambda i, c: (0, c))],
            out_specs=pl.BlockSpec((tm, tc), lambda i, c: (i, c))),
        compiler_params=pltpu.CompilerParams(
            dimension_semantics=("parallel", "parallel")),
    )(y, scale, shift, yd, scale_d, shift_d)


# --------------------------------------------------------------------------- conv glue
def conv1x1_mm(act, w):
    """act: [T, Pp, Cin_p] -> (y [T*Pp, Cout_p], col_sum, col_sumsq)."""
    t, pp, cin_p = act.shape
    return matmul_bn_stats(act.reshape(t * pp, cin_p), w)


def conv3x3_mm(spk, w, n, h, wid, p_valid, stride, dilation):
    """3x3 conv (padding=dilation) on bf16 spikes via bf16 im2col + fused matmul.

    TODO(synk): fold the 9-tap im2col into the matmul K axis (index_map offsets into the
    padded NHWC tensor) so the patch tensor is never materialized in HBM.
    """
    t, pp, cp = spk.shape
    x = spk[:, :p_valid].reshape(t, n, h, wid, cp)
    pad = dilation
    xp = jnp.pad(x, ((0, 0), (0, 0), (pad, pad), (pad, pad), (0, 0)))
    ho = (h + 2 * pad - dilation * 2 - 1) // stride + 1
    wo = (wid + 2 * pad - dilation * 2 - 1) // stride + 1
    taps = []
    for i in range(3):
        for j in range(3):
            di, dj = i * dilation, j * dilation
            taps.append(xp[:, :, di:di + stride * (ho - 1) + 1:stride,
                           dj:dj + stride * (wo - 1) + 1:stride, :])
    patches = jnp.concatenate(taps, axis=-1)          # [T, N, Ho, Wo, 9*Cp]  (bf16)
    p_out = n * ho * wo
    pp_out = _pad_to(p_out, 8)
    a = _pad_rows(patches.reshape(t, p_out, 9 * cp), pp_out).reshape(t * pp_out, 9 * cp)
    y, s, sq = matmul_bn_stats(a, w)
    return y, s, sq, p_out, pp_out, ho, wo


def spatial_subsample(x, n, h, wid, p_valid, stride):
    """Stride the spatial dims of a [T, Pp, Cp] tensor (for the 1x1 downsample conv)."""
    t, pp, cp = x.shape
    if stride == 1:
        return x, p_valid, pp
    xs = x[:, :p_valid].reshape(t, n, h, wid, cp)[:, :, ::stride, ::stride, :]
    ho, wo = xs.shape[2], xs.shape[3]
    p_out = n * ho * wo
    pp_out = _pad_to(p_out, 8)
    return _pad_rows(xs.reshape(t, p_out, cp), pp_out), p_out, pp_out


# --------------------------------------------------------------------------- snn_Bottleneck forward
def bottleneck_forward(x, w, stride, dilation, n, h, wid, p_valid):
    """x: [T, Pp, Cin_p] f32.  Returns ([T, Pp_out, Cout_p] f32, P_out, Ho, Wo)."""
    t, pp, cin_p = x.shape

    # out = spike(x)     (plain LIFSpike == bn_lif with scale=1, shift=0)
    one = jnp.ones((1, cin_p), jnp.float32)
    zero = jnp.zeros((1, cin_p), jnp.float32)
    spk = bn_lif(x, one, zero, p_valid)

    # out = conv1_s(out); out = spike(out)
    y1, s1, q1 = conv1x1_mm(spk, w["w1"])
    sc1, sh1 = bn_scale_shift(s1, q1, t * p_valid, w["g1"], w["b1"], w["alpha1"])
    spk = bn_lif(y1.reshape(t, pp, -1), sc1, sh1, p_valid)

    # out = conv2_s(out); out = spike(out)
    y2, s2, q2, p2, pp2, ho, wo = conv3x3_mm(spk, w["w2"], n, h, wid,
                                             p_valid, stride, dilation)
    sc2, sh2 = bn_scale_shift(s2, q2, t * p2, w["g2"], w["b2"], w["alpha2"])
    spk = bn_lif(y2.reshape(t, pp2, -1), sc2, sh2, p2)

    # out = conv3_s(out)
    y3, s3, q3 = conv1x1_mm(spk, w["w3"])
    sc3, sh3 = bn_scale_shift(s3, q3, t * p2, w["g3"], w["b3"], w["alpha3"])

    if "wd" in w:
        # identity = downsample(x) = tdLayer(conv1x1(stride), tdBN)(x), fused into the add
        xd, _, ppd = spatial_subsample(x, n, h, wid, p_valid, stride)
        assert ppd == pp2
        # NOTE: bf16 cast of the downsample input matches the bf16-weight precision level.
        yd, sd, qd = conv1x1_mm(xd.astype(jnp.bfloat16), w["wd"])
        scd, shd = bn_scale_shift(sd, qd, t * p2, w["gd"], w["bd"], w["alphad"])
        out = bn_add_bn(y3, sc3, sh3, yd, scd, shd)
    else:
        # identity = x  (reference guarantees Cin == planes*4 and stride == 1 here)
        out = bn_add_residual(y3, sc3, sh3, x.reshape(t * pp, cin_p))

    return out.reshape(t, pp2, -1), p2, ho, wo


@partial(jax.jit, static_argnames=("stride", "dilation", "out_channels"))
def _forward(x_nchwt, weights, stride, dilation, out_channels):
    n, cin, h, wid, t = x_nchwt.shape
    cin_p = _pad_to(cin, 128)
    p = n * h * wid
    pp = _pad_to(p, 8)
    x = jnp.transpose(x_nchwt, (4, 0, 2, 3, 1)).reshape(t, p, cin).astype(jnp.float32)
    if (pp, cin_p) != (p, cin):
        xb = jnp.zeros((t, pp, cin_p), jnp.float32).at[:, :p, :cin].set(x)
    else:
        xb = x
    out, p_out, ho, wo = bottleneck_forward(xb, weights, stride, dilation, n, h, wid, p)
    out = out[:, :p_out, :out_channels].reshape(t, n, ho, wo, out_channels)
    return jnp.transpose(out, (1, 4, 2, 3, 0))          # -> [N, Cout, Ho, Wo, T]


def snn_bottleneck(x_nchwt, params):
    """PyTorch-layout wrapper: x [N, Cin, H, W, T] -> out [N, planes*4, Ho, Wo, T]."""
    return _forward(x_nchwt, params["weights"], stride=params["stride"],
                    dilation=params["dilation"], out_channels=params["out_channels"])


# --------------------------------------------------------------------------- parameter construction
def _pad_channel_vec(v, cp):
    return jnp.zeros((cp,), jnp.float32).at[:v.shape[0]].set(v.astype(jnp.float32))


def _conv_weight(key, kh, kw, cin, cout):
    """Kaiming-normal (fan_out) conv weight, pre-padded + pre-cast for the MXU:
    PyTorch [cout, cin, kh, kw] -> bf16 [kh*kw*cin_p, cout_p]."""
    fan_out = cout * kh * kw
    std = math.sqrt(2.0 / fan_out)
    w = jax.random.normal(key, (cout, cin, kh, kw), jnp.float32) * std
    cin_p, cout_p = _pad_to(cin, 128), _pad_to(cout, 128)
    wp = jnp.zeros((kh, kw, cin_p, cout_p), jnp.float32)
    wp = wp.at[:, :, :cin, :cout].set(jnp.transpose(w, (2, 3, 1, 0)))
    return wp.reshape(kh * kw * cin_p, cout_p).astype(jnp.bfloat16)


def make_bottleneck_params(key, inplanes, planes, stride=1, dilation=1,
                           base_width=64, groups=1,
                           alpha_last=1.0, alpha_downsample=1.0):
    """Parameters for one snn_Bottleneck (+ its downsample tdLayer when needed).

    The module spec passes no alpha to norm_layer, so tdBN's default alpha=1.0 is used;
    some tdBN variants scale the last / downsample BN by 1/sqrt(2) - set alpha_last /
    alpha_downsample accordingly if matching those.
    """
    assert groups == 1, "groups != 1 not supported"  # TODO(synk): grouped 3x3 conv
    expansion = 4
    width = int(planes * (base_width / 64.0)) * groups
    out_ch = planes * expansion
    k1, k2, k3, kd = jax.random.split(key, 4)
    wp, op = _pad_to(width, 128), _pad_to(out_ch, 128)
    weights = dict(
        w1=_conv_weight(k1, 1, 1, inplanes, width),
        g1=_pad_channel_vec(jnp.ones(width), wp),
        b1=_pad_channel_vec(jnp.zeros(width), wp),
        alpha1=jnp.float32(1.0),
        w2=_conv_weight(k2, 3, 3, width, width),
        g2=_pad_channel_vec(jnp.ones(width), wp),
        b2=_pad_channel_vec(jnp.zeros(width), wp),
        alpha2=jnp.float32(1.0),
        w3=_conv_weight(k3, 1, 1, width, out_ch),
        g3=_pad_channel_vec(jnp.ones(out_ch), op),
        b3=_pad_channel_vec(jnp.zeros(out_ch), op),
        alpha3=jnp.float32(alpha_last),
    )
    if stride != 1 or inplanes != out_ch:
        weights.update(
            wd=_conv_weight(kd, 1, 1, inplanes, out_ch),
            gd=_pad_channel_vec(jnp.ones(out_ch), op),
            bd=_pad_channel_vec(jnp.zeros(out_ch), op),
            alphad=jnp.float32(alpha_downsample))
    return dict(weights=weights, stride=stride, dilation=dilation, out_channels=out_ch)


# --------------------------------------------------------------------------- main
if __name__ == "__main__":
    root = jax.random.PRNGKey(0)
    k_ua, k_ub, k_p1, k_p2, k_x = jax.random.split(root, 5)

    # ---- unit check: fused matmul + tdBN-stats kernel vs plain jnp ----------------
    a = (jax.random.uniform(k_ua, (256, 128)) < 0.3).astype(jnp.bfloat16)   # "spikes"
    b = (0.1 * jax.random.normal(k_ub, (128, 256))).astype(jnp.bfloat16)
    y, s, sq = matmul_bn_stats(a, b)
    y_ref = jnp.dot(a.astype(jnp.float32), b.astype(jnp.float32))
    assert jnp.allclose(y, y_ref, rtol=1e-2, atol=1e-2)
    assert jnp.allclose(s, jnp.sum(y_ref, axis=0), rtol=1e-2, atol=1e-2)
    assert jnp.allclose(sq, jnp.sum(y_ref * y_ref, axis=0), rtol=1e-2, atol=1e-2)

    # ---- snn_Bottleneck forward ----------------------------------------------------
    T = 4                              # SNN time steps
    N, Cin, H, W = 2, 64, 16, 16
    planes, stride = 32, 2             # width=32, out=128: stride-2 block w/ downsample

    params1 = make_bottleneck_params(k_p1, inplanes=Cin, planes=planes, stride=stride)
    x = jax.random.normal(k_x, (N, Cin, H, W, T), jnp.float32)

    out1 = jax.block_until_ready(snn_bottleneck(x, params1))
    assert out1.shape == (N, planes * 4, H // stride, W // stride, T), out1.shape
    assert bool(jnp.all(jnp.isfinite(out1)))
    assert float(jnp.max(jnp.abs(out1))) > 0.0

    # second block: identity residual path (no downsample), stride 1
    params2 = make_bottleneck_params(k_p2, inplanes=planes * 4, planes=planes, stride=1)
    out2 = jax.block_until_ready(snn_bottleneck(out1, params2))
    assert out2.shape == out1.shape, out2.shape
    assert bool(jnp.all(jnp.isfinite(out2)))

    print("KERNEL_OK")
</pallas_src>

<mosaic_0001>
module attributes {stable_mosaic.version = 11 : i64} {
  func.func @_mm_stats_kernel(%arg0: i32, %arg1: i32, %arg2: memref<256x128xbf16, #tpu.memory_space<vmem>>, %arg3: memref<128x256xbf16, #tpu.memory_space<vmem>>, %arg4: memref<256x256xf32, #tpu.memory_space<vmem>>, %arg5: memref<1x256xf32, #tpu.memory_space<vmem>>, %arg6: memref<1x256xf32, #tpu.memory_space<vmem>>) attributes {dimension_semantics = [#tpu.dimension_semantics<parallel>, #tpu.dimension_semantics<arbitrary>], iteration_bounds = array<i64: 1, 1>, scalar_prefetch = 0 : i64, scratch_operands = 0 : i64, tpu.core_type = #tpu.core_type<tc>, window_params = [{transform_indices = @transform_0, window_bounds = array<i64: 256, 128>}, {transform_indices = @transform_1, window_bounds = array<i64: 128, 256>}, {transform_indices = @transform_2, window_bounds = array<i64: 256, 256>}, {transform_indices = @transform_3, window_bounds = array<i64: 1, 256>}, {transform_indices = @transform_4, window_bounds = array<i64: 1, 256>}]} {
    %c0 = arith.constant 0 : index
    %c0_0 = arith.constant 0 : index
    %0 = vector.load %arg2[%c0, %c0_0] : memref<256x128xbf16, #tpu.memory_space<vmem>>, vector<256x128xbf16>
    %c0_1 = arith.constant 0 : index
    %c0_2 = arith.constant 0 : index
    %1 = vector.load %arg3[%c0_1, %c0_2] : memref<128x256xbf16, #tpu.memory_space<vmem>>, vector<128x256xbf16>
    %cst = arith.constant dense<0.000000e+00> : vector<256x256xf32>
    %2 = tpu.matmul %0, %1, %cst {dimension_numbers = #tpu.dot_dimension_numbers<[1], [0], [0], [1], [0, 0, 1, 1], [], []>} : vector<256x128xbf16>, vector<128x256xbf16>, vector<256x256xf32> -> vector<256x256xf32>
    %c0_3 = arith.constant 0 : index
    %c0_4 = arith.constant 0 : index
    %3 = vector.load %arg4[%c0_3, %c0_4] : memref<256x256xf32, #tpu.memory_space<vmem>>, vector<256x256xf32>
    tpu.vector_store %arg4[%c0_3, %c0_4], %2 {strides = array<i32>} : memref<256x256xf32, #tpu.memory_space<vmem>>, vector<256x256xf32>,
    %c0_i32 = arith.constant 0 : i32
    %4 = arith.cmpi eq, %arg1, %c0_i32 : i32
    %5 = arith.extui %4 : i1 to i32
    %c0_i32_5 = arith.constant 0 : i32
    %6 = arith.cmpi ne, %5, %c0_i32_5 : i32
    scf.if %6 {
      %cst_16 = arith.constant 0.000000e+00 : f32
      %18 = vector.broadcast %cst_16 : f32 to vector<1x256xf32>
      %c0_17 = arith.constant 0 : index
      %c0_18 = arith.constant 0 : index
      %19 = vector.load %arg5[%c0_17, %c0_18] : memref<1x256xf32, #tpu.memory_space<vmem>>, vector<1x256xf32>
      tpu.vector_store %arg5[%c0_17, %c0_18], %18 {strides = array<i32>} : memref<1x256xf32, #tpu.memory_space<vmem>>, vector<1x256xf32>,
      %cst_19 = arith.constant 0.000000e+00 : f32
      %20 = vector.broadcast %cst_19 : f32 to vector<1x256xf32>
      %c0_20 = arith.constant 0 : index
      %c0_21 = arith.constant 0 : index
      %21 = vector.load %arg6[%c0_20, %c0_21] : memref<1x256xf32, #tpu.memory_space<vmem>>, vector<1x256xf32>
      tpu.vector_store %arg6[%c0_20, %c0_21], %20 {strides = array<i32>} : memref<1x256xf32, #tpu.memory_space<vmem>>, vector<1x256xf32>,
    } else {
    }
    %c0_6 = arith.constant 0 : index
    %c0_7 = arith.constant 0 : index
    %7 = vector.load %arg5[%c0_6, %c0_7] : memref<1x256xf32, #tpu.memory_space<vmem>>, vector<1x256xf32>
    %cst_8 = arith.constant dense<0.000000e+00> : vector<256xf32>
    %8 = vector.multi_reduction <add>, %2, %cst_8 [0] : vector<256x256xf32> to vector<256xf32>
    %9 = vector.shape_cast %8 : vector<256xf32> to vector<1x256xf32>
    %10 = arith.addf %7, %9 : vector<1x256xf32>
    %c0_9 = arith.constant 0 : index
    %c0_10 = arith.constant 0 : index
    %11 = vector.load %arg5[%c0_9, %c0_10] : memref<1x256xf32, #tpu.memory_space<vmem>>, vector<1x256xf32>
    tpu.vector_store %arg5[%c0_9, %c0_10], %10 {strides = array<i32>} : memref<1x256xf32, #tpu.memory_space<vmem>>, vector<1x256xf32>,
    %c0_11 = arith.constant 0 : index
    %c0_12 = arith.constant 0 : index
    %12 = vector.load %arg6[%c0_11, %c0_12] : memref<1x256xf32, #tpu.memory_space<vmem>>, vector<1x256xf32>
    %13 = arith.mulf %2, %2 : vector<256x256xf32>
    %cst_13 = arith.constant dense<0.000000e+00> : vector<256xf32>
    %14 = vector.multi_reduction <add>, %13, %cst_13 [0] : vector<256x256xf32> to vector<256xf32>
    %15 = vector.shape_cast %14 : vector<256xf32> to vector<1x256xf32>
    %16 = arith.addf %12, %15 : vector<1x256xf32>
    %c0_14 = arith.constant 0 : index
    %c0_15 = arith.constant 0 : index
    %17 = vector.load %arg6[%c0_14, %c0_15] : memref<1x256xf32, #tpu.memory_space<vmem>>, vector<1x256xf32>
    tpu.vector_store %arg6[%c0_14, %c0_15], %16 {strides = array<i32>} : memref<1x256xf32, #tpu.memory_space<vmem>>, vector<1x256xf32>,
    return
  }
  func.func @transform_0(%arg0: i32, %arg1: i32) -> (i32, i32) {
    %c0_i32 = arith.constant 0 : i32
    %c0_i32_0 = arith.constant 0 : i32
    return %arg1, %c0_i32 : i32, i32
  }
  func.func @transform_1(%arg0: i32, %arg1: i32) -> (i32, i32) {
    %c0_i32 = arith.constant 0 : i32
    %c0_i32_0 = arith.constant 0 : i32
    return %c0_i32, %arg0 : i32, i32
  }
  func.func @transform_2(%arg0: i32, %arg1: i32) -> (i32, i32) {
    %c0_i32 = arith.constant 0 : i32
    return %arg1, %arg0 : i32, i32
  }
  func.func @transform_3(%arg0: i32, %arg1: i32) -> (i32, i32) {
    %c0_i32 = arith.constant 0 : i32
    %c0_i32_0 = arith.constant 0 : i32
    return %c0_i32, %arg0 : i32, i32
  }
  func.func @transform_4(%arg0: i32, %arg1: i32) -> (i32, i32) {
    %c0_i32 = arith.constant 0 : i32
    %c0_i32_0 = arith.constant 0 : i32
    return %c0_i32, %arg0 : i32, i32
  }
}

</mosaic_0001>

<bundles_post_ra>
// kernel: tpu_custom_call.1
= control target key start
LH: loop header
LB: loop body
LE: loop exit
PB: predicated region body
PF: predicated region fallthrough
CT: control target
= control target key end

     0   :  { %10 = vsyncpa [#allocation3], 0  ;;  %s1463_s0 = inlined_call_operand.hbm [shape: bf16[256,128], index: 0, kind: input, shape index: {}]   ;;  %s1464_s1 = inlined_call_operand.hbm [shape: bf16[128,256], index: 1, kind: input, shape index: {}]   ;;  %s1465_s2 = inlined_call_operand.hbm [shape: f32[256,256], index: 2, kind: output, shape index: {0}]   ;;  %s1466_s3 = inlined_call_operand.hbm [shape: f32[1,256], index: 3, kind: output, shape index: {1}]   ;;  %s1467_s4 = inlined_call_operand.hbm [shape: f32[1,256], index: 4, kind: output, shape index: {2}]  }
   0x1   :  { %11 = vsyncpa [#allocation6], 0 }
   0x2   :  { %12 = vsyncpa [#allocation4], 0 }
   0x3   :  { %13 = vsyncpa [#allocation9], 0  ;;  %s18_s17 = sshll.u32 %s1463_s0, 4  ;;  %s1124_s18 = smov [#allocation2]   ;;  %s19_s17 = int_to_ptr.hbm [resolvable:$true] %s18_s17 }
   0x4   :  { %s20_s19 = sshll.u32 %s1124_s18, 4  ;;  %s31_s22 = sshll.u32 %s1464_s1, 4  ;;  %s21_s19 = int_to_ptr.vmem [resolvable:$true] %s20_s19  ;;  %s32_s22 = int_to_ptr.hbm [resolvable:$true] %s31_s22 }
   0x5   :  { %s1125_s23 = smov 64   ;;  %s1126_s24 = smov 4  }
   0x6   :  { %26 = dma.hbm_to_vmem [thread:$0]  %s19_s17, 2048, %s21_s19, [#allocation3], %s1125_s23, %s1125_s23, %s1126_s24  }
   0x7   :  { %s1127_s25 = smov [#allocation5]   ;;  %s1128_s27 = smov 128  }
   0x8   :  { %s33_s26 = sshll.u32 %s1127_s25, 4  ;;  %s1129_s28 = smov 8   ;;  %s34_s26 = int_to_ptr.vmem [resolvable:$true] %s33_s26 }
   0x9   :  { %39 = dma.hbm_to_vmem [thread:$0]  %s32_s22, 2048, %s34_s26, [#allocation6], %s1128_s27, %s1128_s27, %s1129_s28  }
   0xa   :  { %1116 = dma.done.wait [#allocation3], 2048  }
   0xb   :  { %1117 = vsyncadd [#allocation3], 4294965248 }
   0xc   :  { %1118 = dma.done.wait [#allocation6], 2048  }
   0xd   :  { %1119 = vsyncadd [#allocation6], 4294965248  ;;  %v930_v0 = vld [vmem:[#allocation5 + $0x70] sm:$0xf]  ;;  %v967_v1 = vld [vmem:[#allocation5 + $0x74] sm:$0xf0] }
   0xe   :  { %v966_v2 = vld [vmem:[#allocation5 + $0x74] sm:$0xf]  ;;  %v931_v3 = vor.u32 %v967_v1, %v930_v0  ;;  %v932_v4 = vld [vmem:[#allocation5 + $0x78] sm:$0xf0]  ;;  %v922_v5 = vld [vmem:[#allocation5 + $0x60] sm:$0xf] }
   0xf   :  { %v965_v6 = vld [vmem:[#allocation5 + $0x64] sm:$0xf0]  ;;  %v935_v7 = vor.u32 %v966_v2, %v932_v4  ;;  %v964_v8 = vld [vmem:[#allocation5 + $0x64] sm:$0xf]  ;;  %v924_v9 = vld [vmem:[#allocation5 + $0x68] sm:$0xf0] }
  0x10   :  { %272 = vmatpush.bf16.msra.mxu0 %v931_v3  ;;  %v923_v10 = vor.u32 %v965_v6, %v922_v5  ;;  %968 = vmatpush.bf16.msra.mxu2 %v931_v3  ;;  %v927_v11 = vor.u32 %v964_v8, %v924_v9  ;;  %v914_v12 = vld [vmem:[#allocation5 + $0x50] sm:$0xf]  ;;  %v963_v13 = vld [vmem:[#allocation5 + $0x54] sm:$0xf0]  ;;  %v962_v14 = vld [vmem:[#allocation5 + $0x54] sm:$0xf] }
  0x11   :  { %361 = vmatpush.bf16.msra.mxu1 %v935_v7  ;;  %976 = vmatpush.bf16.msra.mxu3 %v935_v7  ;;  %v916_v15 = vld [vmem:[#allocation5 + $0x58] sm:$0xf0]  ;;  %v915_v16 = vor.u32 %v963_v13, %v914_v12  ;;  %v906_v18 = vld [vmem:[#allocation5 + $0x40] sm:$0xf]  ;;  %v961_v19 = vld [vmem:[#allocation5 + $0x44] sm:$0xf0] }
  0x12   :  { %v919_v17 = vor.u32 %v962_v14, %v916_v15  ;;  %v960_v20 = vld [vmem:[#allocation5 + $0x44] sm:$0xf]  ;;  %v908_v21 = vld [vmem:[#allocation5 + $0x48] sm:$0xf0]  ;;  %v907_v22 = vor.u32 %v961_v19, %v906_v18  ;;  %v898_v24 = vld [vmem:[#allocation5 + $0x30] sm:$0xf] }
  0x13   :  { %v911_v23 = vor.u32 %v960_v20, %v908_v21  ;;  %v959_v25 = vld [vmem:[#allocation5 + $0x34] sm:$0xf0]  ;;  %v958_v26 = vld [vmem:[#allocation5 + $0x34] sm:$0xf]  ;;  %v900_v27 = vld [vmem:[#allocation5 + $0x38] sm:$0xf0] }
  0x14   :  { %273 = vmatpush.bf16.msra.mxu0 %v923_v10  ;;  %969 = vmatpush.bf16.msra.mxu2 %v923_v10  ;;  %v899_v28 = vor.u32 %v959_v25, %v898_v24  ;;  %v903_v29 = vor.u32 %v958_v26, %v900_v27  ;;  %v890_v30 = vld [vmem:[#allocation5 + $0x20] sm:$0xf]  ;;  %v957_v31 = vld [vmem:[#allocation5 + $0x24] sm:$0xf0]  ;;  %v956_v32 = vld [vmem:[#allocation5 + $0x24] sm:$0xf] }
  0x15   :  { %362 = vmatpush.bf16.msra.mxu1 %v927_v11  ;;  %977 = vmatpush.bf16.msra.mxu3 %v927_v11  ;;  %v892_v33 = vld [vmem:[#allocation5 + $0x28] sm:$0xf0]  ;;  %v891_v34 = vor.u32 %v957_v31, %v890_v30  ;;  %v882_v36 = vld [vmem:[#allocation5 + $0x10] sm:$0xf]  ;;  %v955_v37 = vld [vmem:[#allocation5 + $0x14] sm:$0xf0] }
  0x16   :  { %v895_v35 = vor.u32 %v956_v32, %v892_v33  ;;  %v954_v38 = vld [vmem:[#allocation5 + $0x14] sm:$0xf]  ;;  %v884_v39 = vld [vmem:[#allocation5 + $0x18] sm:$0xf0]  ;;  %v883_v40 = vor.u32 %v955_v37, %v882_v36  ;;  %v874_v42 = vld [vmem:[#allocation5] sm:$0xf] }
  0x17   :  { %v887_v41 = vor.u32 %v954_v38, %v884_v39  ;;  %v953_v43 = vld [vmem:[#allocation5 + $0x4] sm:$0xf0]  ;;  %v952_v44 = vld [vmem:[#allocation5 + $0x4] sm:$0xf]  ;;  %v876_v45 = vld [vmem:[#allocation5 + $0x8] sm:$0xf0] }
  0x18   :  { %274 = vmatpush.bf16.msra.mxu0 %v915_v16  ;;  %970 = vmatpush.bf16.msra.mxu2 %v915_v16  ;;  %v875_v46 = vor.u32 %v953_v43, %v874_v42  ;;  %v879_v47 = vor.u32 %v952_v44, %v876_v45  ;;  %v936_v48 = vld [vmem:[#allocation2] sm:$0xff]  ;;  %v937_v50 = vld [vmem:[#allocation2 + $0x8] sm:$0xff]  ;;  %v938_v52 = vld [vmem:[#allocation2 + $0x10] sm:$0xff]  ;;  %s1130_s0 = smov [#allocation7]   ;;  %s763_s5 = sshll.u32 %s1465_s2, 4  ;;  %vm602_vm1 = vcmask 1040384   ;;  %s764_s5 = int_to_ptr.hbm [resolvable:$true] %s763_s5 }
  0x19   :  { %363 = vmatpush.bf16.msra.mxu1 %v919_v17  ;;  %978 = vmatpush.bf16.msra.mxu3 %v919_v17  ;;  %v944_v49 = vld [vmem:[#allocation2 + $0x40] sm:$0xff]  ;;  %v945_v51 = vld [vmem:[#allocation2 + $0x48] sm:$0xff]  ;;  %v946_v53 = vld [vmem:[#allocation2 + $0x50] sm:$0xff]  ;;  %s1335_s1 = sshll.u32 %s1130_s0, 4  ;;  %s1131_s2 = smov 256   ;;  %s762_s1 = int_to_ptr.vmem [resolvable:$true] %s1335_s1 }
  0x1a   :  { %v939_v54 = vld [vmem:[#allocation2 + $0x18] sm:$0xff]  ;;  %v940_v56 = vld [vmem:[#allocation2 + $0x20] sm:$0xff]  ;;  %v941_v58 = vld [vmem:[#allocation2 + $0x28] sm:$0xff]  ;;  %s1132_s6 = smov 16   ;;  %s1134_s7 = smov [#allocation8]  }
  0x1b   :  { %v947_v55 = vld [vmem:[#allocation2 + $0x58] sm:$0xff]  ;;  %v948_v57 = vld [vmem:[#allocation2 + $0x60] sm:$0xff]  ;;  %v949_v59 = vld [vmem:[#allocation2 + $0x68] sm:$0xff]  ;;  %s775_s8 = sshll.u32 %s1134_s7, 4  ;;  %s777_s11 = sshll.u32 %s1466_s3, 4  ;;  %s776_s8 = int_to_ptr.vmem [resolvable:$true] %s775_s8  ;;  %s778_s11 = int_to_ptr.hbm [resolvable:$true] %s777_s11 }
  0x1c   :  { %275 = vmatpush.bf16.msra.mxu0 %v907_v22  ;;  %971 = vmatpush.bf16.msra.mxu2 %v907_v22  ;;  %v942_v60 = vld [vmem:[#allocation2 + $0x30] sm:$0xff]  ;;  %v943_v62 = vld [vmem:[#allocation2 + $0x38] sm:$0xff]  ;;  %s1135_s12 = smov [#allocation10]   ;;  %s788_s16 = sshll.u32 %s1467_s4, 4  ;;  %s789_s16 = int_to_ptr.hbm [resolvable:$true] %s788_s16 }
  0x1d   :  { %364 = vmatpush.bf16.msra.mxu1 %v911_v23  ;;  %979 = vmatpush.bf16.msra.mxu3 %v911_v23  ;;  %v950_v61 = vld [vmem:[#allocation2 + $0x70] sm:$0xff]  ;;  %v951_v63 = vld [vmem:[#allocation2 + $0x78] sm:$0xff]  ;;  %s786_s13 = sshll.u32 %s1135_s12, 4  ;;  %s787_s13 = int_to_ptr.vmem [resolvable:$true] %s786_s13 }
  0x20   :  { %276 = vmatpush.bf16.msra.mxu0 %v899_v28  ;;  %972 = vmatpush.bf16.msra.mxu2 %v899_v28 }
  0x21   :  { %365 = vmatpush.bf16.msra.mxu1 %v903_v29  ;;  %980 = vmatpush.bf16.msra.mxu3 %v903_v29 }
  0x24   :  { %277 = vmatpush.bf16.msra.mxu0 %v891_v34  ;;  %973 = vmatpush.bf16.msra.mxu2 %v891_v34 }
  0x25   :  { %366 = vmatpush.bf16.msra.mxu1 %v895_v35  ;;  %981 = vmatpush.bf16.msra.mxu3 %v895_v35 }
  0x28   :  { %278 = vmatpush.bf16.msra.mxu0 %v883_v40  ;;  %974 = vmatpush.bf16.msra.mxu2 %v883_v40 }
  0x29   :  { %367 = vmatpush.bf16.msra.mxu1 %v887_v41  ;;  %982 = vmatpush.bf16.msra.mxu3 %v887_v41 }
  0x2c   :  { %279 = vmatpush.bf16.msra.mxu0 %v875_v46  ;;  %975 = vmatpush.bf16.msra.mxu2 %v875_v46 }
  0x2d   :  { %368 = vmatpush.bf16.msra.mxu1 %v879_v47  ;;  %983 = vmatpush.bf16.msra.mxu3 %v879_v47 }
  0x2f   :  { %280 = vmatmul.bf16.vlgmr.msra.gmra.mxu0 %v936_v48  ;;  %320 = vmatmul.bf16.vlgmr.msra.gmra.mxu2 %v944_v49 }
  0x30   :  { %369 = vmatmul.bf16.vlgmr.msra.gmra.mxu1 %v936_v48  ;;  %409 = vmatmul.bf16.vlgmr.msra.gmra.mxu3 %v944_v49 }
  0x3f   :  { %285 = vmatmul.bf16.gmra.mxu0 %v937_v50  ;;  %325 = vmatmul.bf16.gmra.mxu2 %v945_v51 }
  0x40   :  { %374 = vmatmul.bf16.gmra.mxu1 %v937_v50  ;;  %414 = vmatmul.bf16.gmra.mxu3 %v945_v51 }
  0x4f   :  { %290 = vmatmul.bf16.gmra.mxu0 %v938_v52  ;;  %330 = vmatmul.bf16.gmra.mxu2 %v946_v53 }
  0x50   :  { %379 = vmatmul.bf16.gmra.mxu1 %v938_v52  ;;  %419 = vmatmul.bf16.gmra.mxu3 %v946_v53 }
  0x5f   :  { %295 = vmatmul.bf16.gmra.mxu0 %v939_v54  ;;  %335 = vmatmul.bf16.gmra.mxu2 %v947_v55 }
  0x60   :  { %384 = vmatmul.bf16.gmra.mxu1 %v939_v54  ;;  %424 = vmatmul.bf16.gmra.mxu3 %v947_v55 }
  0x6f   :  { %300 = vmatmul.bf16.gmra.mxu0 %v940_v56  ;;  %340 = vmatmul.bf16.gmra.mxu2 %v948_v57 }
  0x70   :  { %389 = vmatmul.bf16.gmra.mxu1 %v940_v56  ;;  %429 = vmatmul.bf16.gmra.mxu3 %v948_v57 }
  0x7f   :  { %305 = vmatmul.bf16.gmra.mxu0 %v941_v58  ;;  %345 = vmatmul.bf16.gmra.mxu2 %v949_v59 }
  0x80   :  { %394 = vmatmul.bf16.gmra.mxu1 %v941_v58  ;;  %434 = vmatmul.bf16.gmra.mxu3 %v949_v59 }
  0x8f   :  { %310 = vmatmul.bf16.gmra.mxu0 %v942_v60  ;;  %350 = vmatmul.bf16.gmra.mxu2 %v950_v61 }
  0x90   :  { %399 = vmatmul.bf16.gmra.mxu1 %v942_v60  ;;  %439 = vmatmul.bf16.gmra.mxu3 %v950_v61 }
  0x9f   :  { %315 = vmatmul.bf16.gmra.mxu0 %v943_v62  ;;  %355 = vmatmul.bf16.gmra.mxu2 %v951_v63 }
  0xa0   :  { %404 = vmatmul.bf16.gmra.mxu1 %v943_v62  ;;  %444 = vmatmul.bf16.gmra.mxu3 %v951_v63 }
  0xac   :  { %v281_v0 = vpop.f32.mrf.mxu0 }
  0xad   :  { %450 = vst [vmem:[#allocation7] sm:$0xff] %v281_v0  ;;  %v370_v1 = vpop.f32.mrf.mxu1  ;;  %v612_v5 = vmul.f32 %v281_v0, %v281_v0 }
  0xae   :  { %451 = vst [vmem:[#allocation7 + $0x8] sm:$0xff] %v370_v1  ;;  %v613_v9 = vmul.f32 %v370_v1, %v370_v1 }
  0xb2   :  { %v1167_v2 = vpop.f32.mrf.mxu2 }
  0xb3   :  { %v1169_v3 = vpop.f32.mrf.mxu3  ;;  %482 = vst [vmem:[#allocation7 + $0x100] sm:$0xff] %v1167_v2 }
  0xb4   :  { %v283_v4 = vpop.f32.mrf.mxu0  ;;  %483 = vst [vmem:[#allocation7 + $0x108] sm:$0xff] %v1169_v3 }
  0xb5   :  { %452 = vst [vmem:[#allocation7 + $0x10] sm:$0xff] %v283_v4  ;;  %v525_v6 = vadd.f32 %v283_v4, %v281_v0  ;;  %v614_v7 = vmul.f32 %v283_v4, %v283_v4  ;;  %v372_v8 = vpop.f32.mrf.mxu1 }
  0xb6   :  { %453 = vst [vmem:[#allocation7 + $0x18] sm:$0xff] %v372_v8  ;;  %v562_v10 = vadd.f32 %v372_v8, %v370_v1  ;;  %v615_v11 = vmul.f32 %v372_v8, %v372_v8 }
  0xb7   :  { %v676_v12 = vadd.f32 %v614_v7, %v612_v5 }
  0xb8   :  { %v713_v13 = vadd.f32 %v615_v11, %v613_v9 }
  0xba   :  { %v1173_v14 = vpop.f32.mrf.mxu2 }
  0xbb   :  { %v1175_v15 = vpop.f32.mrf.mxu3  ;;  %484 = vst [vmem:[#allocation7 + $0x110] sm:$0xff] %v1173_v14 }
  0xbc   :  { %v286_v16 = vpop.f32.mrf.mxu0  ;;  %485 = vst [vmem:[#allocation7 + $0x118] sm:$0xff] %v1175_v15 }
  0xbd   :  { %454 = vst [vmem:[#allocation7 + $0x20] sm:$0xff] %v286_v16  ;;  %v526_v17 = vadd.f32 %v525_v6, %v286_v16  ;;  %v616_v18 = vmul.f32 %v286_v16, %v286_v16  ;;  %v375_v19 = vpop.f32.mrf.mxu1 }
  0xbe   :  { %455 = vst [vmem:[#allocation7 + $0x28] sm:$0xff] %v375_v19  ;;  %v563_v20 = vadd.f32 %v562_v10, %v375_v19  ;;  %v617_v21 = vmul.f32 %v375_v19, %v375_v19 }
  0xbf   :  { %v677_v22 = vadd.f32 %v676_v12, %v616_v18 }
  0xc0   :  { %v714_v23 = vadd.f32 %v713_v13, %v617_v21 }
  0xc2   :  { %v1179_v24 = vpop.f32.mrf.mxu2 }
  0xc3   :  { %v1181_v25 = vpop.f32.mrf.mxu3  ;;  %486 = vst [vmem:[#allocation7 + $0x120] sm:$0xff] %v1179_v24 }
  0xc4   :  { %v288_v26 = vpop.f32.mrf.mxu0  ;;  %487 = vst [vmem:[#allocation7 + $0x128] sm:$0xff] %v1181_v25 }
  0xc5   :  { %456 = vst [vmem:[#allocation7 + $0x30] sm:$0xff] %v288_v26  ;;  %v527_v27 = vadd.f32 %v526_v17, %v288_v26  ;;  %v618_v28 = vmul.f32 %v288_v26, %v288_v26  ;;  %v377_v29 = vpop.f32.mrf.mxu1 }
  0xc6   :  { %457 = vst [vmem:[#allocation7 + $0x38] sm:$0xff] %v377_v29  ;;  %v564_v30 = vadd.f32 %v563_v20, %v377_v29  ;;  %v619_v31 = vmul.f32 %v377_v29, %v377_v29 }
  0xc7   :  { %v678_v32 = vadd.f32 %v677_v22, %v618_v28 }
  0xc8   :  { %v715_v33 = vadd.f32 %v714_v23, %v619_v31 }
  0xca   :  { %v1185_v34 = vpop.f32.mrf.mxu2 }
  0xcb   :  { %v1187_v35 = vpop.f32.mrf.mxu3  ;;  %488 = vst [vmem:[#allocation7 + $0x130] sm:$0xff] %v1185_v34 }
  0xcc   :  { %v291_v36 = vpop.f32.mrf.mxu0  ;;  %489 = vst [vmem:[#allocation7 + $0x138] sm:$0xff] %v1187_v35 }
  0xcd   :  { %458 = vst [vmem:[#allocation7 + $0x40] sm:$0xff] %v291_v36  ;;  %v1191_v37 = vadd.f32 %v527_v27, %v291_v36  ;;  %v620_v38 = vmul.f32 %v291_v36, %v291_v36  ;;  %v380_v39 = vpop.f32.mrf.mxu1 }
  0xce   :  { %459 = vst [vmem:[#allocation7 + $0x48] sm:$0xff] %v380_v39  ;;  %v1193_v40 = vadd.f32 %v564_v30, %v380_v39  ;;  %v621_v41 = vmul.f32 %v380_v39, %v380_v39 }
  0xcf   :  { %v1195_v42 = vadd.f32 %v678_v32, %v620_v38 }
  0xd0   :  { %v1197_v43 = vadd.f32 %v715_v33, %v621_v41 }
  0xd2   :  { %v1199_v44 = vpop.f32.mrf.mxu2 }
  0xd3   :  { %v1201_v45 = vpop.f32.mrf.mxu3  ;;  %490 = vst [vmem:[#allocation7 + $0x140] sm:$0xff] %v1199_v44 }
  0xd4   :  { %v1204_v46 = vpop.f32.mrf.mxu0  ;;  %491 = vst [vmem:[#allocation7 + $0x148] sm:$0xff] %v1201_v45 }
  0xd5   :  { %460 = vst [vmem:[#allocation7 + $0x50] sm:$0xff] %v1204_v46  ;;  %v382_v47 = vpop.f32.mrf.mxu1  ;;  %v622_v16 = vmul.f32 %v1204_v46, %v1204_v46  ;;  %v529_v18 = vadd.f32 %v1191_v37, %v1204_v46 }
  0xd6   :  { %461 = vst [vmem:[#allocation7 + $0x58] sm:$0xff] %v382_v47  ;;  %v623_v17 = vmul.f32 %v382_v47, %v382_v47  ;;  %v566_v20 = vadd.f32 %v1193_v40, %v382_v47 }
  0xd7   :  { %v680_v23 = vadd.f32 %v1195_v42, %v622_v16 }
  0xd8   :  { %v717_v29 = vadd.f32 %v1197_v43, %v623_v17 }
  0xda   :  { %v1208_v48 = vpop.f32.mrf.mxu2 }
  0xdb   :  { %v1210_v49 = vpop.f32.mrf.mxu3  ;;  %492 = vst [vmem:[#allocation7 + $0x150] sm:$0xff] %v1208_v48 }
  0xdc   :  { %v296_v50 = vpop.f32.mrf.mxu0  ;;  %493 = vst [vmem:[#allocation7 + $0x158] sm:$0xff] %v1210_v49 }
  0xdd   :  { %462 = vst [vmem:[#allocation7 + $0x60] sm:$0xff] %v296_v50  ;;  %v1214_v51 = vpop.f32.mrf.mxu1  ;;  %v624_v19 = vmul.f32 %v296_v50, %v296_v50  ;;  %v530_v26 = vadd.f32 %v529_v18, %v296_v50 }
  0xde   :  { %463 = vst [vmem:[#allocation7 + $0x68] sm:$0xff] %v1214_v51  ;;  %v625_v21 = vmul.f32 %v1214_v51, %v1214_v51  ;;  %v567_v30 = vadd.f32 %v566_v20, %v1214_v51 }
  0xdf   :  { %v681_v33 = vadd.f32 %v680_v23, %v624_v19 }
  0xe0   :  { %v718_v39 = vadd.f32 %v717_v29, %v625_v21 }
  0xe2   :  { %v1217_v52 = vpop.f32.mrf.mxu2 }
  0xe3   :  { %v1219_v53 = vpop.f32.mrf.mxu3  ;;  %494 = vst [vmem:[#allocation7 + $0x160] sm:$0xff] %v1217_v52 }
  0xe4   :  { %v1222_v54 = vpop.f32.mrf.mxu0  ;;  %495 = vst [vmem:[#allocation7 + $0x168] sm:$0xff] %v1219_v53 }
  0xe5   :  { %464 = vst [vmem:[#allocation7 + $0x70] sm:$0xff] %v1222_v54  ;;  %v1226_v55 = vpop.f32.mrf.mxu1  ;;  %v626_v27 = vmul.f32 %v1222_v54, %v1222_v54  ;;  %v531_v36 = vadd.f32 %v530_v26, %v1222_v54 }
  0xe6   :  { %465 = vst [vmem:[#allocation7 + $0x78] sm:$0xff] %v1226_v55  ;;  %v627_v31 = vmul.f32 %v1226_v55, %v1226_v55  ;;  %v568_v40 = vadd.f32 %v567_v30, %v1226_v55 }
  0xe7   :  { %v682_v42 = vadd.f32 %v681_v33, %v626_v27 }
  0xe8   :  { %v719_v47 = vadd.f32 %v718_v39, %v627_v31 }
  0xea   :  { %v1229_v56 = vpop.f32.mrf.mxu2 }
  0xeb   :  { %v1231_v57 = vpop.f32.mrf.mxu3  ;;  %496 = vst [vmem:[#allocation7 + $0x170] sm:$0xff] %v1229_v56 }
  0xec   :  { %v1234_v58 = vpop.f32.mrf.mxu0  ;;  %497 = vst [vmem:[#allocation7 + $0x178] sm:$0xff] %v1231_v57 }
  0xed   :  { %466 = vst [vmem:[#allocation7 + $0x80] sm:$0xff] %v1234_v58  ;;  %v1238_v59 = vpop.f32.mrf.mxu1  ;;  %v628_v37 = vmul.f32 %v1234_v58, %v1234_v58  ;;  %v532_v43 = vadd.f32 %v531_v36, %v1234_v58 }
  0xee   :  { %467 = vst [vmem:[#allocation7 + $0x88] sm:$0xff] %v1238_v59  ;;  %v629_v41 = vmul.f32 %v1238_v59, %v1238_v59  ;;  %v569_v50 = vadd.f32 %v568_v40, %v1238_v59 }
  0xef   :  { %v683_v54 = vadd.f32 %v682_v42, %v628_v37 }
  0xf0   :  { %v720_v18 = vadd.f32 %v719_v47, %v629_v41 }
  0xf2   :  { %v1241_v60 = vpop.f32.mrf.mxu2 }
  0xf3   :  { %v1243_v61 = vpop.f32.mrf.mxu3  ;;  %498 = vst [vmem:[#allocation7 + $0x180] sm:$0xff] %v1241_v60 }
  0xf4   :  { %v303_v62 = vpop.f32.mrf.mxu0  ;;  %499 = vst [vmem:[#allocation7 + $0x188] sm:$0xff] %v1243_v61 }
  0xf5   :  { %468 = vst [vmem:[#allocation7 + $0x90] sm:$0xff] %v303_v62  ;;  %v392_v63 = vpop.f32.mrf.mxu1  ;;  %v630_v46 = vmul.f32 %v303_v62, %v303_v62  ;;  %v533_v16 = vadd.f32 %v532_v43, %v303_v62 }
  0xf6   :  { %469 = vst [vmem:[#allocation7 + $0x98] sm:$0xff] %v392_v63  ;;  %v631_v51 = vmul.f32 %v392_v63, %v392_v63  ;;  %v570_v19 = vadd.f32 %v569_v50, %v392_v63 }
  0xf7   :  { %v684_v21 = vadd.f32 %v683_v54, %v630_v46 }
  0xf8   :  { %v721_v59 = vadd.f32 %v720_v18, %v631_v51 }
  0xfa   :  { %v1247_v0 = vpop.f32.mrf.mxu2 }
  0xfb   :  { %v1249_v1 = vpop.f32.mrf.mxu3  ;;  %500 = vst [vmem:[#allocation7 + $0x190] sm:$0xff] %v1247_v0 }
  0xfc   :  { %v306_v4 = vpop.f32.mrf.mxu0  ;;  %501 = vst [vmem:[#allocation7 + $0x198] sm:$0xff] %v1249_v1 }
  0xfd   :  { %470 = vst [vmem:[#allocation7 + $0xa0] sm:$0xff] %v306_v4  ;;  %v1253_v5 = vpop.f32.mrf.mxu1  ;;  %v632_v17 = vmul.f32 %v306_v4, %v306_v4  ;;  %v534_v23 = vadd.f32 %v533_v16, %v306_v4 }
  0xfe   :  { %471 = vst [vmem:[#allocation7 + $0xa8] sm:$0xff] %v1253_v5  ;;  %v633_v55 = vmul.f32 %v1253_v5, %v1253_v5  ;;  %v571_v62 = vadd.f32 %v570_v19, %v1253_v5 }
  0xff   :  { %v685_v29 = vadd.f32 %v684_v21, %v632_v17 }
 0x100   :  { %v722_v33 = vadd.f32 %v721_v59, %v633_v55 }
 0x102   :  { %v1256_v6 = vpop.f32.mrf.mxu2 }
 0x103   :  { %v1258_v7 = vpop.f32.mrf.mxu3  ;;  %502 = vst [vmem:[#allocation7 + $0x1a0] sm:$0xff] %v1256_v6 }
 0x104   :  { %v1261_v8 = vpop.f32.mrf.mxu0  ;;  %503 = vst [vmem:[#allocation7 + $0x1a8] sm:$0xff] %v1258_v7 }
 0x105   :  { %472 = vst [vmem:[#allocation7 + $0xb0] sm:$0xff] %v1261_v8  ;;  %v1265_v9 = vpop.f32.mrf.mxu1  ;;  %v634_v58 = vmul.f32 %v1261_v8, %v1261_v8  ;;  %v535_v30 = vadd.f32 %v534_v23, %v1261_v8 }
 0x106   :  { %473 = vst [vmem:[#allocation7 + $0xb8] sm:$0xff] %v1265_v9  ;;  %v635_v63 = vmul.f32 %v1265_v9, %v1265_v9  ;;  %v572_v36 = vadd.f32 %v571_v62, %v1265_v9  ;;  %v644_v62 = vmul.f32 %v1167_v2, %v1167_v2 }
 0x107   :  { %v686_v37 = vadd.f32 %v685_v29, %v634_v58  ;;  %v645_v29 = vmul.f32 %v1169_v3, %v1169_v3 }
 0x108   :  { %v723_v41 = vadd.f32 %v722_v33, %v635_v63 }
 0x10a   :  { %v1268_v10 = vpop.f32.mrf.mxu2 }
 0x10b   :  { %v1270_v11 = vpop.f32.mrf.mxu3  ;;  %504 = vst [vmem:[#allocation7 + $0x1b0] sm:$0xff] %v1268_v10 }
 0x10c   :  { %v1273_v12 = vpop.f32.mrf.mxu0  ;;  %505 = vst [vmem:[#allocation7 + $0x1b8] sm:$0xff] %v1270_v11 }
 0x10d   :  { %474 = vst [vmem:[#allocation7 + $0xc0] sm:$0xff] %v1273_v12  ;;  %v1277_v13 = vpop.f32.mrf.mxu1  ;;  %v636_v4 = vmul.f32 %v1273_v12, %v1273_v12  ;;  %v536_v39 = vadd.f32 %v535_v30, %v1273_v12 }
 0x10e   :  { %475 = vst [vmem:[#allocation7 + $0xc8] sm:$0xff] %v1277_v13  ;;  %v637_v5 = vmul.f32 %v1277_v13, %v1277_v13  ;;  %v573_v42 = vadd.f32 %v572_v36, %v1277_v13 }
 0x10f   :  { %v687_v43 = vadd.f32 %v686_v37, %v636_v4 }
 0x110   :  { %v724_v50 = vadd.f32 %v723_v41, %v637_v5  ;;  %v647_v5 = vmul.f32 %v1175_v15, %v1175_v15 }
 0x112   :  { %v1287_v22 = vpop.f32.mrf.mxu2 }
 0x113   :  { %v1292_v28 = vpop.f32.mrf.mxu3  ;;  %506 = vst [vmem:[#allocation7 + $0x1c0] sm:$0xff] %v1287_v22 }
 0x114   :  { %v313_v32 = vpop.f32.mrf.mxu0  ;;  %507 = vst [vmem:[#allocation7 + $0x1c8] sm:$0xff] %v1292_v28 }
 0x115   :  { %476 = vst [vmem:[#allocation7 + $0xd0] sm:$0xff] %v313_v32  ;;  %v402_v38 = vpop.f32.mrf.mxu1  ;;  %v638_v40 = vmul.f32 %v313_v32, %v313_v32  ;;  %v537_v46 = vadd.f32 %v536_v39, %v313_v32 }
 0x116   :  { %477 = vst [vmem:[#allocation7 + $0xd8] sm:$0xff] %v402_v38  ;;  %v639_v8 = vmul.f32 %v402_v38, %v402_v38  ;;  %v574_v51 = vadd.f32 %v573_v42, %v402_v38 }
 0x117   :  { %v688_v9 = vadd.f32 %v687_v43, %v638_v40 }
 0x118   :  { %v725_v12 = vadd.f32 %v724_v50, %v639_v8 }
 0x11a   :  { %v1310_v20 = vpop.f32.mrf.mxu2 }
 0x11b   :  { %v1314_v26 = vpop.f32.mrf.mxu3  ;;  %508 = vst [vmem:[#allocation7 + $0x1d0] sm:$0xff] %v1310_v20 }
 0x11c   :  { %v316_v27 = vpop.f32.mrf.mxu0  ;;  %509 = vst [vmem:[#allocation7 + $0x1d8] sm:$0xff] %v1314_v26 }
 0x11d   :  { %478 = vst [vmem:[#allocation7 + $0xe0] sm:$0xff] %v316_v27  ;;  %v405_v31 = vpop.f32.mrf.mxu1  ;;  %v640_v47 = vmul.f32 %v316_v27, %v316_v27  ;;  %v538_v17 = vadd.f32 %v537_v46, %v316_v27  ;;  %v651_v46 = vmul.f32 %v1187_v35, %v1187_v35 }
 0x11e   :  { %479 = vst [vmem:[#allocation7 + $0xe8] sm:$0xff] %v405_v31  ;;  %v641_v54 = vmul.f32 %v405_v31, %v405_v31  ;;  %v575_v19 = vadd.f32 %v574_v51, %v405_v31  ;;  %v646_v31 = vmul.f32 %v1173_v14, %v1173_v14 }
 0x11f   :  { %v689_v13 = vadd.f32 %v688_v9, %v640_v47  ;;  %v652_v9 = vmul.f32 %v1199_v44, %v1199_v44 }
 0x120   :  { %v726_v38 = vadd.f32 %v725_v12, %v641_v54 }
 0x122   :  { %v1329_v16 = vpop.f32.mrf.mxu2 }
 0x123   :  { %v1331_v18 = vpop.f32.mrf.mxu3  ;;  %510 = vst [vmem:[#allocation7 + $0x1e0] sm:$0xff] %v1329_v16 }
 0x124   :  { %v318_v55 = vpop.f32.mrf.mxu0  ;;  %511 = vst [vmem:[#allocation7 + $0x1e8] sm:$0xff] %v1331_v18 }
 0x125   :  { %480 = vst [vmem:[#allocation7 + $0xf0] sm:$0xff] %v318_v55  ;;  %v539_v32 = vadd.f32 %v538_v17, %v318_v55  ;;  %v642_v21 = vmul.f32 %v318_v55, %v318_v55  ;;  %v407_v23 = vpop.f32.mrf.mxu1 }
 0x126   :  { %481 = vst [vmem:[#allocation7 + $0xf8] sm:$0xff] %v407_v23  ;;  %v576_v58 = vadd.f32 %v575_v19, %v407_v23  ;;  %v643_v59 = vmul.f32 %v407_v23, %v407_v23  ;;  %v1133_v19 = vmov 0.0  }
 0x127   :  { %v540_v63 = vadd.f32 %v539_v32, %v1167_v2  ;;  %v690_v27 = vadd.f32 %v689_v13, %v642_v21  ;;  %v654_v13 = vmul.f32 %v1208_v48, %v1208_v48  ;;  %v655_v21 = vmul.f32 %v1210_v49, %v1210_v49 }
 0x128   :  { %v577_v30 = vadd.f32 %v576_v58, %v1169_v3  ;;  %v727_v4 = vadd.f32 %v726_v38, %v643_v59  ;;  %v648_v3 = vmul.f32 %v1179_v24, %v1179_v24  ;;  %v656_v58 = vmul.f32 %v1217_v52, %v1217_v52 }
 0x129   :  { %v541_v33 = vadd.f32 %v540_v63, %v1173_v14  ;;  %v691_v36 = vadd.f32 %v690_v27, %v644_v62  ;;  %v649_v14 = vmul.f32 %v1181_v25, %v1181_v25  ;;  %v657_v62 = vmul.f32 %v1219_v53, %v1219_v53 }
 0x12a   :  { %v578_v2 = vadd.f32 %v577_v30, %v1175_v15  ;;  %v728_v37 = vadd.f32 %v727_v4, %v645_v29  ;;  %v1353_v39 = vpop.f32.mrf.mxu2  ;;  %v518_v15 = vlaneseq }
 0x12b   :  { %v542_v40 = vadd.f32 %v541_v33, %v1179_v24  ;;  %v692_v41 = vadd.f32 %v691_v36, %v646_v31  ;;  %v1358_v42 = vpop.f32.mrf.mxu3  ;;  %512 = vst [vmem:[#allocation7 + $0x1f0] sm:$0xff] %v1353_v39  ;;  %v650_v24 = vmul.f32 %v1185_v34, %v1185_v34 }
 0x12c   :  { %v579_v8 = vadd.f32 %v578_v2, %v1181_v25  ;;  %v729_v43 = vadd.f32 %v728_v37, %v647_v5  ;;  %513 = vst [vmem:[#allocation7 + $0x1f8] sm:$0xff] %v1358_v42  ;;  %vm1371_vm0 = vcmp.lt.s32.totalorder %v518_v15, 256 }
 0x12d   :  { %v543_v47 = vadd.f32 %v542_v40, %v1185_v34  ;;  %v693_v50 = vadd.f32 %v692_v41, %v648_v3  ;;  %769 = dma.vmem_to_hbm [thread:$0]  %s762_s1, 8192, %s764_s5, [#allocation4], %s1131_s2, %s1131_s2, %s1132_s6   ;;  %522 = vst.msk [vmem:[#allocation8] sm:$0x3] %vm1371_vm0, %v1133_v19  ;;  %v653_v34 = vmul.f32 %v1201_v45, %v1201_v45 }
 0x12e   :  { %v580_v51 = vadd.f32 %v579_v8, %v1187_v35  ;;  %v730_v54 = vadd.f32 %v729_v43, %v649_v14  ;;  %523 = vst.msk [vmem:[#allocation10] sm:$0x3] %vm1371_vm0, %v1133_v19  ;;  %v670_v19 = vmul.f32 %v1310_v20, %v1310_v20 }
 0x12f   :  { %v544_v17 = vadd.f32 %v543_v47, %v1199_v44  ;;  %v694_v12 = vadd.f32 %v693_v50, %v650_v24 }
 0x130   :  { %v581_v35 = vadd.f32 %v580_v51, %v1201_v45  ;;  %v731_v55 = vadd.f32 %v730_v54, %v651_v46  ;;  %v668_v51 = vmul.f32 %v1287_v22, %v1287_v22 }
 0x131   :  { %v545_v32 = vadd.f32 %v544_v17, %v1208_v48  ;;  %v695_v44 = vadd.f32 %v694_v12, %v652_v9  ;;  %v658_v48 = vmul.f32 %v1229_v56, %v1229_v56  ;;  %v669_v9 = vmul.f32 %v1292_v28, %v1292_v28 }
 0x132   :  { %v582_v23 = vadd.f32 %v581_v35, %v1210_v49  ;;  %v732_v38 = vadd.f32 %v731_v55, %v653_v34  ;;  %v659_v49 = vmul.f32 %v1231_v57, %v1231_v57  ;;  %v671_v35 = vmul.f32 %v1314_v26, %v1314_v26 }
 0x133   :  { %v696_v45 = vadd.f32 %v695_v44, %v654_v13  ;;  %v546_v59 = vadd.f32 %v545_v32, %v1217_v52  ;;  %v660_v52 = vmul.f32 %v1241_v60, %v1241_v60  ;;  %v672_v13 = vmul.f32 %v1329_v16, %v1329_v16 }
 0x134   :  { %v733_v63 = vadd.f32 %v732_v38, %v655_v21  ;;  %v583_v27 = vadd.f32 %v582_v23, %v1219_v53  ;;  %v661_v53 = vmul.f32 %v1243_v61, %v1243_v61  ;;  %v673_v44 = vmul.f32 %v1331_v18, %v1331_v18 }
 0x135   :  { %v547_v29 = vadd.f32 %v546_v59, %v1229_v56  ;;  %v697_v30 = vadd.f32 %v696_v45, %v656_v58  ;;  %v662_v56 = vmul.f32 %v1247_v0, %v1247_v0  ;;  %v674_v23 = vmul.f32 %v1353_v39, %v1353_v39 }
 0x136   :  { %v584_v4 = vadd.f32 %v583_v27, %v1231_v57  ;;  %v734_v31 = vadd.f32 %v733_v63, %v657_v62  ;;  %v663_v57 = vmul.f32 %v1249_v1, %v1249_v1  ;;  %v675_v58 = vmul.f32 %v1358_v42, %v1358_v42 }
 0x137   :  { %v548_v33 = vadd.f32 %v547_v29, %v1241_v60  ;;  %v698_v36 = vadd.f32 %v697_v30, %v658_v48  ;;  %v664_v60 = vmul.f32 %v1256_v6, %v1256_v6 }
 0x138   :  { %v585_v5 = vadd.f32 %v584_v4, %v1243_v61  ;;  %v735_v2 = vadd.f32 %v734_v31, %v659_v49  ;;  %v665_v61 = vmul.f32 %v1258_v7, %v1258_v7 }
 0x139   :  { %v549_v37 = vadd.f32 %v548_v33, %v1247_v0  ;;  %v699_v3 = vadd.f32 %v698_v36, %v660_v52  ;;  %v666_v0 = vmul.f32 %v1268_v10, %v1268_v10 }
 0x13a   :  { %v586_v40 = vadd.f32 %v585_v5, %v1249_v1  ;;  %v736_v41 = vadd.f32 %v735_v2, %v661_v53  ;;  %v667_v1 = vmul.f32 %v1270_v11, %v1270_v11 }
 0x13b   :  { %v550_v14 = vadd.f32 %v549_v37, %v1256_v6  ;;  %v700_v8 = vadd.f32 %v699_v3, %v662_v56 }
 0x13c   :  { %v587_v43 = vadd.f32 %v586_v40, %v1258_v7  ;;  %v737_v15 = vadd.f32 %v736_v41, %v663_v57  ;;  %v524_v41 = vld [vmem:[#allocation8] sm:$0x3] }
 0x13d   :  { %v551_v46 = vadd.f32 %v550_v14, %v1268_v10  ;;  %v701_v24 = vadd.f32 %v700_v8, %v664_v60 }
 0x13e   :  { %v588_v47 = vadd.f32 %v587_v43, %v1270_v11  ;;  %v738_v50 = vadd.f32 %v737_v15, %v665_v61  ;;  %v611_v61 = vld [vmem:[#allocation10] sm:$0x3] }
 0x13f   :  { %v552_v6 = vadd.f32 %v551_v46, %v1287_v22  ;;  %v702_v54 = vadd.f32 %v701_v24, %v666_v0 }
 0x140   :  { %v589_v7 = vadd.f32 %v588_v47, %v1292_v28  ;;  %v739_v17 = vadd.f32 %v738_v50, %v667_v1 }
 0x141   :  { %v703_v10 = vadd.f32 %v702_v54, %v668_v51  ;;  %v553_v12 = vadd.f32 %v552_v6, %v1310_v20 }
 0x142   :  { %v740_v11 = vadd.f32 %v739_v17, %v669_v9  ;;  %v590_v34 = vadd.f32 %v589_v7, %v1314_v26 }
 0x143   :  { %v704_v22 = vadd.f32 %v703_v10, %v670_v19  ;;  %v554_v55 = vadd.f32 %v553_v12, %v1329_v16 }
 0x144   :  { %v741_v28 = vadd.f32 %v740_v11, %v671_v35  ;;  %v591_v32 = vadd.f32 %v590_v34, %v1331_v18 }
 0x145   :  { %v705_v21 = vadd.f32 %v704_v22, %v672_v13  ;;  %v555_v20 = vadd.f32 %v554_v55, %v1353_v39 }
 0x146   :  { %v742_v38 = vadd.f32 %v741_v28, %v673_v44  ;;  %v592_v26 = vadd.f32 %v591_v32, %v1358_v42 }
 0x147   :  { %v556_v45 = vrot.slane %v555_v20, 4  ;;  %v706_v16 = vadd.f32 %v705_v21, %v674_v23 }
 0x148   :  { %v593_v59 = vrot.slane %v592_v26, 4  ;;  %v743_v62 = vadd.f32 %v742_v38, %v675_v58 }
 0x149   :  { %v557_v63 = vadd.f32 %v556_v45, %v555_v20  ;;  %v707_v27 = vrot.slane %v706_v16, 4 }
 0x14a   :  { %v594_v48 = vadd.f32 %v593_v59, %v592_v26  ;;  %v744_v18 = vrot.slane %v743_v62, 4 }
 0x14b   :  { %v558_v29 = vrot.slane %v557_v63, 2  ;;  %v708_v30 = vadd.f32 %v707_v27, %v706_v16 }
 0x14c   :  { %v595_v49 = vrot.slane %v594_v48, 2  ;;  %v745_v4 = vadd.f32 %v744_v18, %v743_v62 }
 0x14d   :  { %v559_v31 = vadd.f32 %v558_v29, %v557_v63  ;;  %v709_v39 = vrot.slane %v708_v30, 2 }
 0x14e   :  { %v596_v52 = vadd.f32 %v595_v49, %v594_v48  ;;  %v746_v33 = vrot.slane %v745_v4, 2 }
 0x14f   :  { %v710_v36 = vadd.f32 %v709_v39, %v708_v30  ;;  %v560_v42 = vrot.slane %v559_v31, 1 }
 0x150   :  { %v597_v53 = vrot.slane %v596_v52, 1  ;;  %v747_v5 = vadd.f32 %v746_v33, %v745_v4 }
 0x151   :  { %v711_v37 = vrot.slane %v710_v36, 1  ;;  %v561_v40 = vadd.f32 %v560_v42, %v559_v31 }
 0x152   :  { %v598_v2 = vadd.f32 %v597_v53, %v596_v52  ;;  %v748_v56 = vrot.slane %v747_v5, 1 }
 0x153   :  { %v712_v14 = vadd.f32 %v711_v37, %v710_v36 }
 0x154   :  { %v601_v3 = vrot.slane %v598_v2, 7  ;;  %v749_v57 = vadd.f32 %v748_v56, %v747_v5 }
 0x156   :  { %v752_v60 = vrot.slane %v749_v57, 7  ;;  %v603_v8 = vsel %vm602_vm1, %v561_v40, %v601_v3 }
 0x157   :  { %v605_v43 = vadd.f32 %v603_v8, %v524_v41 }
 0x158   :  { %v753_v15 = vsel %vm602_vm1, %v712_v14, %v752_v60 }
 0x159   :  { %610 = vst.msk [vmem:[#allocation8] sm:$0x3] %vm1371_vm0, %v605_v43  ;;  %v755_v0 = vadd.f32 %v753_v15, %v611_v61 }
 0x15a   :  { %780 = dma.vmem_to_hbm [thread:$0]  %s776_s8, 32, %s778_s11, [#allocation9]  }
 0x15b   :  { %756 = vst.msk [vmem:[#allocation10] sm:$0x3] %vm1371_vm0, %v755_v0 }
 0x15c   :  { %791 = dma.vmem_to_hbm [thread:$0]  %s787_s13, 32, %s789_s16, [#allocation9]  }
 0x15d   :  { %1120 = dma.done.wait [#allocation4], 8192  }
 0x15e   :  { %1121 = vsyncadd [#allocation4], 4294959104 }
 0x15f   :  { %1122 = dma.done.wait [#allocation9], 64  }
 0x160   :  { %1123 = vsyncadd [#allocation9], 4294967232 }
 0x161   :  { %804 = vsyncpa [#allocation3], 1 }
 0x162   :  { %805 = vsyncpa [#allocation6], 1 }
 0x163   :  { %806 = vsyncpa [#allocation4], 1 }
 0x164   :  { %807 = vsyncpa [#allocation9], 1 }

</bundles_post_ra>
